<compile_context>
chip_gen: v7x
topology: tpu7x:2x2x1
jax: 0.10.0
libtpu: 0.0.40
codegen_flags: <defaults>
</compile_context>

<pallas_src>
import functools

import jax
import jax.numpy as jnp
from jax import lax
from jax.experimental import pallas as pl
from jax.experimental.pallas import tpu as pltpu


# ----------------------------------------------------------------------------
# Streaming path (one-hot gather over full vocab rows)
# ----------------------------------------------------------------------------
def _lm_stream_kernel(inp_ref, tgt_ref, msk_ref, loss_out_ref, mask_out_ref,
                      loss_acc, mask_acc, *, row_tile, blocks_per_part,
                      n_blocks, n_valid, needs_valid, has_overhang):
    p = pl.program_id(0)
    s = pl.program_id(1)
    blk = p * blocks_per_part + s

    @pl.when(s == 0)
    def _():
        loss_acc[...] = jnp.zeros_like(loss_acc)
        mask_acc[...] = jnp.zeros_like(mask_acc)

    def compute():
        inp = inp_ref[...]                    # (row_tile, V) native dtype (no upcast)
        tgt = tgt_ref[...]                    # (row_tile, 1) int32
        msk = msk_ref[...]                    # (row_tile, 1) float32

        tn, v = inp.shape
        col_ids = lax.broadcasted_iota(jnp.int32, (1, v), 1)    # (1, V) -> broadcast
        onehot = col_ids == tgt                                 # (row_tile, V) bool

        if needs_valid:
            # Last real block overhangs the (unpadded) row count: neutralize the
            # tail rows so garbage never reaches the accumulators.
            row_ids = blk * row_tile + lax.broadcasted_iota(jnp.int32, (tn, 1), 0)
            row_valid = row_ids < n_valid
            onehot = onehot & row_valid
            msk = jnp.where(row_valid, msk, 0.0)

        # At most one non-zero per row -> the native-dtype lane reduce is exact;
        # only the tiny (row_tile, 1) gathered column is cast to f32.
        gathered = jnp.sum(jnp.where(onehot, inp, 0.0), axis=-1, keepdims=True)
        gathered = gathered.astype(jnp.float32)

        loss_acc[...] += jnp.sum(-gathered * msk).reshape(1, 1)
        mask_acc[...] += jnp.sum(msk).reshape(1, 1)

    if has_overhang:
        # Clamped duplicate blocks (round-up of the 2-part split) skip ALL compute.
        pl.when(blk < n_blocks)(compute)
    else:
        compute()

    @pl.when(s == blocks_per_part - 1)
    def _():
        loss_out_ref[...] = jnp.broadcast_to(loss_acc[0, 0], loss_out_ref.shape)
        mask_out_ref[...] = jnp.broadcast_to(mask_acc[0, 0], mask_out_ref.shape)


# ----------------------------------------------------------------------------
# Slab-gather path (per-row 128-lane slab DMA, targets scalar-prefetched to SMEM)
# ----------------------------------------------------------------------------
def _lm_slab_kernel(tgt_sm, inp_hbm, tgt_ref, msk_ref, loss_out_ref, mask_out_ref,
                    gbuf, sems, loss_acc, mask_acc, *, sub, k_sub, n_valid, vocab):
    s = pl.program_id(0)
    base_row = s * (sub * k_sub)

    @pl.when(s == 0)
    def _():
        loss_acc[...] = jnp.zeros_like(loss_acc)
        mask_acc[...] = jnp.zeros_like(mask_acc)

    def issue(sb, slot):
        # One (1, 128) slab DMA per row of the sub-batch; each copy has its own
        # semaphore so all `sub` copies can be in flight simultaneously.
        @pl.loop(0, sub)
        def _(j):
            r = jnp.minimum(base_row + sb * sub + j, n_valid - 1)   # clamp pad rows
            t = tgt_sm[r]
            col = jnp.clip((t // 128) * 128, 0, vocab - 128)
            if vocab % 128 == 0:
                col = pl.multiple_of(col, 128)
            pltpu.make_async_copy(
                inp_hbm.at[pl.ds(r, 1), pl.ds(col, 128)],
                gbuf.at[slot, pl.ds(j, 1), :],
                sems.at[slot, j],
            ).start()

    issue(0, 0)
    lane = lax.broadcasted_iota(jnp.int32, (1, 128), 1)

    @pl.loop(0, k_sub)
    def _(sb):
        slot = sb % 2

        @pl.when(sb + 1 < k_sub)
        def _():
            issue(sb + 1, 1 - slot)

        # Wait for this sub-batch's row DMAs (same-shape stand-in descriptors).
        @pl.loop(0, sub)
        def _(j):
            pltpu.make_async_copy(
                inp_hbm.at[pl.ds(0, 1), pl.ds(0, 128)],
                gbuf.at[slot, pl.ds(j, 1), :],
                sems.at[slot, j],
            ).wait()

        r0 = pl.multiple_of(sb * sub, sub)
        tgt_sub = tgt_ref[pl.ds(r0, sub), :]                      # (sub, 1) int32
        msk_sub = msk_ref[pl.ds(r0, sub), :]                      # (sub, 1) f32
        col0 = jnp.clip((tgt_sub // 128) * 128, 0, vocab - 128)
        off = tgt_sub - col0                                      # in-slab offset
        row_ids = base_row + sb * sub + lax.broadcasted_iota(jnp.int32, (sub, 1), 0)
        onehot = (lane == off) & (row_ids < n_valid)              # (sub, 128)

        g = gbuf[slot].astype(jnp.float32)                        # (sub, 128)
        # Deferred reduction: accumulate vreg-shaped partials, reduce in epilogue.
        loss_acc[...] += jnp.where(onehot, -g, 0.0) * msk_sub
        mask_acc[...] += msk_sub                                  # pad rows have msk==0

    @pl.when(s == pl.num_programs(0) - 1)
    def _():
        loss_out_ref[...] = jnp.broadcast_to(jnp.sum(loss_acc[...]), loss_out_ref.shape)
        mask_out_ref[...] = jnp.broadcast_to(jnp.sum(mask_acc[...]), mask_out_ref.shape)


# ----------------------------------------------------------------------------
# Host-side helpers / wrappers
# ----------------------------------------------------------------------------
def _cdiv(a, b):
    return (a + b - 1) // b


def _vmem_capacity_bytes():
    try:
        return int(pltpu.get_tpu_info().vmem_capacity_bytes)
    except Exception:
        return 64 * 1024 * 1024          # conservative (v7x-sized) fallback


def _default_num_parts():
    # 2 TensorCores per JAX device on v4 / v5p / v7x; 1 on v5e / v6e.
    try:
        kind = jax.devices()[0].device_kind.lower()
    except Exception:
        return 1
    return 2 if any(tag in kind for tag in ("v4", "v5p", "v7")) else 1


def _stream_call(inp, tgt, msk, n, V, row_tile, num_parts):
    itemsize = jnp.dtype(inp.dtype).itemsize
    min_rows = max(8, 32 // itemsize)            # sublane packing: 8 f32 / 16 bf16
    stream_bpr = 2 * V * itemsize                # double-buffered (rows, V) input block
    side_bpr = 2 * 2 * 128 * 4                   # lane-padded (rows,1) tgt+msk, x2 bufs
    vmem_cap = _vmem_capacity_bytes()

    if row_tile is None:
        # ~45% of physical VMEM for the streaming double buffer (+ side buffers):
        # ~28 MiB blocks on 128-MiB chips, ~14 MiB on v7x's 64 MiB.  Bytes-only cap.
        budget = min(int(vmem_cap * 0.45), 64 * 1024 * 1024)
        row_tile = max(min_rows, budget // (stream_bpr + side_bpr))
    if row_tile >= n:
        row_tile = n                             # single full-extent block (always legal)
    else:
        row_tile = max(min_rows, (row_tile // min_rows) * min_rows)

    n_blocks = _cdiv(n, row_tile)
    if num_parts is None:
        num_parts = _default_num_parts()
    num_parts = max(1, min(num_parts, n_blocks))
    blocks_per_part = _cdiv(n_blocks, num_parts)
    has_overhang = num_parts * blocks_per_part != n_blocks
    needs_valid = n_blocks * row_tile != n

    def in_map(p, s):
        # Clamp so overhanging steps re-read a legal block; in-kernel pl.when skips them.
        return (jnp.minimum(p * blocks_per_part + s, n_blocks - 1), 0)

    def out_map(p, s):
        return (p, 0, 0)

    kernel = functools.partial(
        _lm_stream_kernel, row_tile=row_tile, blocks_per_part=blocks_per_part,
        n_blocks=n_blocks, n_valid=n, needs_valid=needs_valid,
        has_overhang=has_overhang)

    used = (row_tile * (stream_bpr + side_bpr)             # input + padded tgt/msk bufs
            + 2 * 2 * num_parts * 8 * 128 * 4              # double-buffered outputs
            + (2 << 20))                                   # internal scratch slack
    vmem_limit = int(min(vmem_cap, max(32 * 1024 * 1024, used + (4 << 20))))

    loss_parts, mask_parts = pl.pallas_call(
        kernel,
        out_shape=(
            jax.ShapeDtypeStruct((num_parts, 8, 128), jnp.float32),
            jax.ShapeDtypeStruct((num_parts, 8, 128), jnp.float32),
        ),
        grid_spec=pltpu.PrefetchScalarGridSpec(
            num_scalar_prefetch=0,
            grid=(num_parts, blocks_per_part),
            in_specs=[
                pl.BlockSpec((row_tile, V), in_map),
                pl.BlockSpec((row_tile, 1), in_map),
                pl.BlockSpec((row_tile, 1), in_map),
            ],
            out_specs=[
                pl.BlockSpec((1, 8, 128), out_map),
                pl.BlockSpec((1, 8, 128), out_map),
            ],
            scratch_shapes=[
                pltpu.VMEM((1, 1), jnp.float32),   # per-part loss accumulator
                pltpu.VMEM((1, 1), jnp.float32),   # per-part mask accumulator
            ],
        ),
        compiler_params=pltpu.CompilerParams(
            dimension_semantics=("parallel", "arbitrary"),
            vmem_limit_bytes=vmem_limit,
        ),
    )(inp, tgt, msk)
    return jnp.sum(loss_parts[:, 0, 0]), jnp.sum(mask_parts[:, 0, 0])


def _slab_call(inp, tgt, msk, n, V):
    sub = 32                                    # rows per DMA sub-batch (2*sub DMA sems)
    k_sub = max(1, min(8, _cdiv(n, sub)))       # sub-batches per grid step
    rows_per_step = sub * k_sub
    num_steps = _cdiv(n, rows_per_step)
    n_pad = num_steps * rows_per_step
    if n_pad != n:
        pad = n_pad - n
        tgt = jnp.pad(tgt, ((0, pad), (0, 0)))  # pad targets with 0
        msk = jnp.pad(msk, ((0, pad), (0, 0)))  # pad mask with 0 -> no contribution
    tgt_sm = tgt[:, 0]                          # (n_pad,) int32 scalar-prefetch (SMEM)

    kernel = functools.partial(_lm_slab_kernel, sub=sub, k_sub=k_sub,
                               n_valid=n, vocab=V)

    loss_o, mask_o = pl.pallas_call(
        kernel,
        out_shape=(
            jax.ShapeDtypeStruct((8, 128), jnp.float32),
            jax.ShapeDtypeStruct((8, 128), jnp.float32),
        ),
        grid_spec=pltpu.PrefetchScalarGridSpec(
            num_scalar_prefetch=1,
            grid=(num_steps,),
            in_specs=[
                pl.BlockSpec(memory_space=pl.ANY),                        # (n, V) in HBM
                pl.BlockSpec((rows_per_step, 1), lambda s, tsm: (s, 0)),  # targets
                pl.BlockSpec((rows_per_step, 1), lambda s, tsm: (s, 0)),  # mask
            ],
            out_specs=[
                pl.BlockSpec((8, 128), lambda s, tsm: (0, 0)),
                pl.BlockSpec((8, 128), lambda s, tsm: (0, 0)),
            ],
            scratch_shapes=[
                pltpu.VMEM((2, sub, 128), inp.dtype),   # double-buffered gathered slabs
                pltpu.SemaphoreType.DMA((2, sub)),      # one sem per in-flight row DMA
                pltpu.VMEM((sub, 128), jnp.float32),    # deferred loss accumulator
                pltpu.VMEM((sub, 1), jnp.float32),      # deferred mask accumulator
            ],
        ),
        compiler_params=pltpu.CompilerParams(
            dimension_semantics=("arbitrary",),
            vmem_limit_bytes=32 * 1024 * 1024,
        ),
    )(tgt_sm, inp, tgt, msk)
    return loss_o[0, 0], mask_o[0, 0]


@functools.partial(jax.jit, static_argnames=("row_tile", "num_parts", "gather"))
def language_model_criterion(inputs, targets, mask, *, row_tile=None,
                             num_parts=None, gather="auto"):
    """JAX/Pallas equivalent of LanguageModelCriterion.forward.

    inputs:  (B, T, V) log-probs (any float dtype; streamed/gathered in native dtype)
    targets: (B, T_tgt) int token ids (truncated to T)
    mask:    (B, T_tgt) float mask    (truncated to T)
    returns: scalar f32 = sum(-inputs[b,t,targets[b,t]] * mask[b,t]) / sum(mask)
    """
    B, T, V = inputs.shape
    targets = targets[:, :T]
    mask = mask[:, :T]
    n = B * T

    inp = inputs.reshape(n, V)
    tgt = targets.reshape(n, 1).astype(jnp.int32)
    msk = mask.reshape(n, 1).astype(jnp.float32)

    if gather not in ("auto", "stream", "slab"):
        raise ValueError(f"unknown gather mode: {gather!r}")
    use_slab = gather == "slab"
    if gather == "auto":
        # Slab gather pays off for large vocabularies; it needs 128-aligned slabs
        # and the whole target table to fit in SMEM.
        # TODO(synk): tile / DMA-stage the scalar-prefetched target table to lift
        # the row-count limit on the slab-gather path.
        use_slab = (V >= 1024) and (V % 128 == 0) and (n <= 64 * 1024)
    if V < 128:
        use_slab = False

    if use_slab:
        loss_sum, mask_sum = _slab_call(inp, tgt, msk, n, V)
    else:
        loss_sum, mask_sum = _stream_call(inp, tgt, msk, n, V, row_tile, num_parts)
    return loss_sum / mask_sum


def _reference(inputs, targets, mask):
    B, T, V = inputs.shape
    t = targets[:, :T].reshape(-1).astype(jnp.int32)
    m = mask[:, :T].reshape(-1).astype(jnp.float32)
    flat = inputs.reshape(-1, V).astype(jnp.float32)
    g = jnp.take_along_axis(flat, t[:, None], axis=1)[:, 0]
    return jnp.sum(-g * m) / jnp.sum(m)


if __name__ == "__main__":
    # Case 1: f32 streaming path, auto tile (single full-extent block),
    # targets/mask longer than T (exercises truncation).
    k1, k2, k3 = jax.random.split(jax.random.PRNGKey(0), 3)
    B, T, T_tgt, V = 2, 8, 10, 128
    logits = jax.random.normal(k1, (B, T, V), dtype=jnp.float32)
    inputs = jax.nn.log_softmax(logits, axis=-1)
    targets = jax.random.randint(k2, (B, T_tgt), 0, V, dtype=jnp.int32)
    mask = (jax.random.uniform(k3, (B, T_tgt)) > 0.3).astype(jnp.float32)
    mask = mask.at[0, 0].set(1.0)   # ensure sum(mask) > 0
    out1 = language_model_criterion(inputs, targets, mask)
    jax.block_until_ready(out1)
    ref1 = _reference(inputs, targets, mask)
    assert jnp.allclose(out1, ref1, atol=1e-5, rtol=1e-5), (out1, ref1)

    # Case 2: bf16 streaming, forced small tile + forced 2-part split ->
    # exercises multi-block accumulation, the clamped-overhang skip and
    # in-kernel tail-row masking (no HBM padding of the big tensor).
    k4, k5, k6 = jax.random.split(jax.random.PRNGKey(1), 3)
    B2, T2, V2 = 3, 11, 256
    logits2 = jax.random.normal(k4, (B2, T2, V2), dtype=jnp.float32)
    inputs2 = jax.nn.log_softmax(logits2, axis=-1).astype(jnp.bfloat16)
    targets2 = jax.random.randint(k5, (B2, T2), 0, V2, dtype=jnp.int32)
    mask2 = (jax.random.uniform(k6, (B2, T2)) > 0.3).astype(jnp.float32)
    mask2 = mask2.at[0, 0].set(1.0)
    out2 = language_model_criterion(inputs2, targets2, mask2,
                                    row_tile=16, num_parts=2, gather="stream")
    jax.block_until_ready(out2)
    ref2 = _reference(inputs2, targets2, mask2)
    assert jnp.allclose(out2, ref2, atol=1e-4, rtol=1e-4), (out2, ref2)

    # Case 3: f32 streaming with vocab not a multiple of 128 (full-extent lanes).
    k7, k8, k9 = jax.random.split(jax.random.PRNGKey(2), 3)
    B3, T3, V3 = 2, 5, 100
    logits3 = jax.random.normal(k7, (B3, T3, V3), dtype=jnp.float32)
    inputs3 = jax.nn.log_softmax(logits3, axis=-1)
    targets3 = jax.random.randint(k8, (B3, T3), 0, V3, dtype=jnp.int32)
    mask3 = (jax.random.uniform(k9, (B3, T3)) > 0.3).astype(jnp.float32)
    mask3 = mask3.at[0, 0].set(1.0)
    out3 = language_model_criterion(inputs3, targets3, mask3)
    jax.block_until_ready(out3)
    ref3 = _reference(inputs3, targets3, mask3)
    assert jnp.allclose(out3, ref3, atol=1e-5, rtol=1e-5), (out3, ref3)

    # Case 4: larger vocab -> auto-selects the slab-gather path (targets in SMEM,
    # log-probs stay in HBM, per-row 128-lane slab DMA), f32.
    k10, k11, k12 = jax.random.split(jax.random.PRNGKey(3), 3)
    B4, T4, V4 = 2, 24, 2048
    logits4 = jax.random.normal(k10, (B4, T4, V4), dtype=jnp.float32)
    inputs4 = jax.nn.log_softmax(logits4, axis=-1)
    targets4 = jax.random.randint(k11, (B4, T4), 0, V4, dtype=jnp.int32)
    mask4 = (jax.random.uniform(k12, (B4, T4)) > 0.3).astype(jnp.float32)
    mask4 = mask4.at[0, 0].set(1.0)
    out4 = language_model_criterion(inputs4, targets4, mask4)
    jax.block_until_ready(out4)
    ref4 = _reference(inputs4, targets4, mask4)
    assert jnp.allclose(out4, ref4, atol=1e-5, rtol=1e-5), (out4, ref4)

    print("KERNEL_OK")
</pallas_src>

<mosaic_0001>
module attributes {stable_mosaic.version = 11 : i64} {
  func.func @_lm_stream_kernel(%arg0: i32, %arg1: i32, %arg2: memref<16x128xf32, #tpu.memory_space<vmem>>, %arg3: memref<16x1xi32, #tpu.memory_space<vmem>>, %arg4: memref<16x1xf32, #tpu.memory_space<vmem>>, %arg5: memref<1x8x128xf32, #tpu.memory_space<vmem>>, %arg6: memref<1x8x128xf32, #tpu.memory_space<vmem>>, %arg7: memref<1x1xf32, #tpu.memory_space<vmem>>, %arg8: memref<1x1xf32, #tpu.memory_space<vmem>>) attributes {dimension_semantics = [#tpu.dimension_semantics<parallel>, #tpu.dimension_semantics<arbitrary>], iteration_bounds = array<i64: 1, 1>, scalar_prefetch = 0 : i64, scratch_operands = 2 : i64, tpu.core_type = #tpu.core_type<tc>, window_params = [{transform_indices = @transform_0, window_bounds = array<i64: 16, 128>}, {transform_indices = @transform_1, window_bounds = array<i64: 16, 1>}, {transform_indices = @transform_2, window_bounds = array<i64: 16, 1>}, {transform_indices = @transform_3, window_bounds = array<i64: 1, 8, 128>}, {transform_indices = @transform_4, window_bounds = array<i64: 1, 8, 128>}]} {
    %c0_i32 = arith.constant 0 : i32
    %0 = arith.cmpi eq, %arg1, %c0_i32 : i32
    %1 = arith.extui %0 : i1 to i32
    %c0_i32_0 = arith.constant 0 : i32
    %2 = arith.cmpi ne, %1, %c0_i32_0 : i32
    scf.if %2 {
      %cst_20 = arith.constant 0.000000e+00 : f32
      %36 = vector.broadcast %cst_20 : f32 to vector<1x1xf32>
      %c0_21 = arith.constant 0 : index
      %c0_22 = arith.constant 0 : index
      %37 = vector.load %arg7[%c0_21, %c0_22] : memref<1x1xf32, #tpu.memory_space<vmem>>, vector<1x1xf32>
      tpu.vector_store %arg7[%c0_21, %c0_22], %36 {strides = array<i32>} : memref<1x1xf32, #tpu.memory_space<vmem>>, vector<1x1xf32>,
      %cst_23 = arith.constant 0.000000e+00 : f32
      %38 = vector.broadcast %cst_23 : f32 to vector<1x1xf32>
      %c0_24 = arith.constant 0 : index
      %c0_25 = arith.constant 0 : index
      %39 = vector.load %arg8[%c0_24, %c0_25] : memref<1x1xf32, #tpu.memory_space<vmem>>, vector<1x1xf32>
      tpu.vector_store %arg8[%c0_24, %c0_25], %38 {strides = array<i32>} : memref<1x1xf32, #tpu.memory_space<vmem>>, vector<1x1xf32>,
    } else {
    }
    %c0 = arith.constant 0 : index
    %c0_1 = arith.constant 0 : index
    %3 = vector.load %arg2[%c0, %c0_1] : memref<16x128xf32, #tpu.memory_space<vmem>>, vector<16x128xf32>
    %c0_2 = arith.constant 0 : index
    %c0_3 = arith.constant 0 : index
    %4 = vector.load %arg3[%c0_2, %c0_3] : memref<16x1xi32, #tpu.memory_space<vmem>>, vector<16x1xi32>
    %c0_4 = arith.constant 0 : index
    %c0_5 = arith.constant 0 : index
    %5 = vector.load %arg4[%c0_4, %c0_5] : memref<16x1xf32, #tpu.memory_space<vmem>>, vector<16x1xf32>
    %6 = tpu.iota {dimensions = array<i32: 1>} : vector<1x128xi32>
    %7 = vector.broadcast %6 : vector<1x128xi32> to vector<16x128xi32>
    %8 = vector.broadcast %4 : vector<16x1xi32> to vector<16x128xi32>
    %9 = arith.cmpi eq, %7, %8 : vector<16x128xi32>
    %cst = arith.constant 0.000000e+00 : f32
    %10 = vector.broadcast %cst : f32 to vector<16x128xf32>
    %11 = arith.select %9, %3, %10 : vector<16x128xi1>, vector<16x128xf32>
    %cst_6 = arith.constant dense<0.000000e+00> : vector<16xf32>
    %12 = vector.multi_reduction <add>, %11, %cst_6 [1] : vector<16x128xf32> to vector<16xf32>
    %13 = vector.shape_cast %12 : vector<16xf32> to vector<16x1xf32>
    %c0_7 = arith.constant 0 : index
    %c0_8 = arith.constant 0 : index
    %14 = vector.load %arg7[%c0_7, %c0_8] : memref<1x1xf32, #tpu.memory_space<vmem>>, vector<1x1xf32>
    %cst_9 = arith.constant 0.000000e+00 : f32
    %15 = vector.broadcast %cst_9 : f32 to vector<16x1xf32>
    %16 = arith.subf %15, %13 : vector<16x1xf32>
    %17 = arith.mulf %16, %5 : vector<16x1xf32>
    %18 = vector.shape_cast %17 : vector<16x1xf32> to vector<1x16x1xf32>
    %cst_10 = arith.constant dense<0.000000e+00> : vector<1xf32>
    %19 = vector.multi_reduction <add>, %18, %cst_10 [1, 2] : vector<1x16x1xf32> to vector<1xf32>
    %20 = vector.shape_cast %19 : vector<1xf32> to vector<1x1x1xf32>
    %21 = vector.extract %20[0, 0, 0] : f32 from vector<1x1x1xf32>
    %22 = vector.broadcast %21 : f32 to vector<1x1xf32>
    %23 = arith.addf %14, %22 : vector<1x1xf32>
    %c0_11 = arith.constant 0 : index
    %c0_12 = arith.constant 0 : index
    %24 = vector.load %arg7[%c0_11, %c0_12] : memref<1x1xf32, #tpu.memory_space<vmem>>, vector<1x1xf32>
    tpu.vector_store %arg7[%c0_11, %c0_12], %23 {strides = array<i32>} : memref<1x1xf32, #tpu.memory_space<vmem>>, vector<1x1xf32>,
    %c0_13 = arith.constant 0 : index
    %c0_14 = arith.constant 0 : index
    %25 = vector.load %arg8[%c0_13, %c0_14] : memref<1x1xf32, #tpu.memory_space<vmem>>, vector<1x1xf32>
    %26 = vector.shape_cast %5 : vector<16x1xf32> to vector<1x16x1xf32>
    %cst_15 = arith.constant dense<0.000000e+00> : vector<1xf32>
    %27 = vector.multi_reduction <add>, %26, %cst_15 [1, 2] : vector<1x16x1xf32> to vector<1xf32>
    %28 = vector.shape_cast %27 : vector<1xf32> to vector<1x1x1xf32>
    %29 = vector.extract %28[0, 0, 0] : f32 from vector<1x1x1xf32>
    %30 = vector.broadcast %29 : f32 to vector<1x1xf32>
    %31 = arith.addf %25, %30 : vector<1x1xf32>
    %c0_16 = arith.constant 0 : index
    %c0_17 = arith.constant 0 : index
    %32 = vector.load %arg8[%c0_16, %c0_17] : memref<1x1xf32, #tpu.memory_space<vmem>>, vector<1x1xf32>
    tpu.vector_store %arg8[%c0_16, %c0_17], %31 {strides = array<i32>} : memref<1x1xf32, #tpu.memory_space<vmem>>, vector<1x1xf32>,
    %c0_i32_18 = arith.constant 0 : i32
    %33 = arith.cmpi eq, %arg1, %c0_i32_18 : i32
    %34 = arith.extui %33 : i1 to i32
    %c0_i32_19 = arith.constant 0 : i32
    %35 = arith.cmpi ne, %34, %c0_i32_19 : i32
    scf.if %35 {
      %c0_20 = arith.constant 0 : index
      %c0_21 = arith.constant 0 : index
      %36 = vector.load %arg7[%c0_20, %c0_21] : memref<1x1xf32, #tpu.memory_space<vmem>>, vector<1x1xf32>
      %37 = vector.extract %36[0, 0] : f32 from vector<1x1xf32>
      %38 = vector.broadcast %37 : f32 to vector<1x8x128xf32>
      %c0_22 = arith.constant 0 : index
      %c0_23 = arith.constant 0 : index
      %c0_24 = arith.constant 0 : index
      %39 = vector.load %arg5[%c0_22, %c0_23, %c0_24] : memref<1x8x128xf32, #tpu.memory_space<vmem>>, vector<1x8x128xf32>
      tpu.vector_store %arg5[%c0_22, %c0_23, %c0_24], %38 {strides = array<i32>} : memref<1x8x128xf32, #tpu.memory_space<vmem>>, vector<1x8x128xf32>,
      %c0_25 = arith.constant 0 : index
      %c0_26 = arith.constant 0 : index
      %40 = vector.load %arg8[%c0_25, %c0_26] : memref<1x1xf32, #tpu.memory_space<vmem>>, vector<1x1xf32>
      %41 = vector.extract %40[0, 0] : f32 from vector<1x1xf32>
      %42 = vector.broadcast %41 : f32 to vector<1x8x128xf32>
      %c0_27 = arith.constant 0 : index
      %c0_28 = arith.constant 0 : index
      %c0_29 = arith.constant 0 : index
      %43 = vector.load %arg6[%c0_27, %c0_28, %c0_29] : memref<1x8x128xf32, #tpu.memory_space<vmem>>, vector<1x8x128xf32>
      tpu.vector_store %arg6[%c0_27, %c0_28, %c0_29], %42 {strides = array<i32>} : memref<1x8x128xf32, #tpu.memory_space<vmem>>, vector<1x8x128xf32>,
    } else {
    }
    return
  }
  func.func @transform_0(%arg0: i32, %arg1: i32) -> (i32, i32) {
    %c1_i32 = arith.constant 1 : i32
    %0 = arith.muli %arg0, %c1_i32 : i32
    %1 = arith.addi %0, %arg1 : i32
    %c0_i32 = arith.constant 0 : i32
    %2 = arith.minsi %1, %c0_i32 : i32
    %c0_i32_0 = arith.constant 0 : i32
    %c0_i32_1 = arith.constant 0 : i32
    return %2, %c0_i32_0 : i32, i32
  }
  func.func @transform_1(%arg0: i32, %arg1: i32) -> (i32, i32) {
    %c1_i32 = arith.constant 1 : i32
    %0 = arith.muli %arg0, %c1_i32 : i32
    %1 = arith.addi %0, %arg1 : i32
    %c0_i32 = arith.constant 0 : i32
    %2 = arith.minsi %1, %c0_i32 : i32
    %c0_i32_0 = arith.constant 0 : i32
    %c0_i32_1 = arith.constant 0 : i32
    return %2, %c0_i32_0 : i32, i32
  }
  func.func @transform_2(%arg0: i32, %arg1: i32) -> (i32, i32) {
    %c1_i32 = arith.constant 1 : i32
    %0 = arith.muli %arg0, %c1_i32 : i32
    %1 = arith.addi %0, %arg1 : i32
    %c0_i32 = arith.constant 0 : i32
    %2 = arith.minsi %1, %c0_i32 : i32
    %c0_i32_0 = arith.constant 0 : i32
    %c0_i32_1 = arith.constant 0 : i32
    return %2, %c0_i32_0 : i32, i32
  }
  func.func @transform_3(%arg0: i32, %arg1: i32) -> (i32, i32, i32) {
    %c0_i32 = arith.constant 0 : i32
    %c0_i32_0 = arith.constant 0 : i32
    %c0_i32_1 = arith.constant 0 : i32
    return %arg0, %c0_i32, %c0_i32_0 : i32, i32, i32
  }
  func.func @transform_4(%arg0: i32, %arg1: i32) -> (i32, i32, i32) {
    %c0_i32 = arith.constant 0 : i32
    %c0_i32_0 = arith.constant 0 : i32
    %c0_i32_1 = arith.constant 0 : i32
    return %arg0, %c0_i32, %c0_i32_0 : i32, i32, i32
  }
}

</mosaic_0001>

<bundles_post_ra>
// kernel: language_model_criterion.1
= control target key start
LH: loop header
LB: loop body
LE: loop exit
PB: predicated region body
PF: predicated region fallthrough
CT: control target
= control target key end

     0   :  { %v227_v0 = vmov 0   ;;  %v125_v3 = vlaneseq  ;;  %vm146_vm2 = vcmask 7168   ;;  %vm116_vm3 = vcmask 0   ;;  %s282_s1 = inlined_call_operand.vmem [shape: s32[16,1], index: 1, kind: input, shape index: {}]   ;;  %s283_s0 = inlined_call_operand.vmem [shape: f32[16,128], index: 0, kind: input, shape index: {}]   ;;  %s284_s2 = inlined_call_operand.vmem [shape: f32[16,1], index: 2, kind: input, shape index: {}]   ;;  %s285_s3 = inlined_call_operand.vmem [shape: f32[1,8,128], index: 3, kind: output, shape index: {0}]   ;;  %s286_s4 = inlined_call_operand.vmem [shape: f32[1,8,128], index: 4, kind: output, shape index: {1}]  }
   0x1   :  { %226 = vset.pattern.permute.xlu0 %v227_v0  ;;  %v121_v1 = vld [vmem:[%s282_s1] sm:$0xff]  ;;  %v122_v2 = vld [vmem:[%s282_s1 + $0x8] sm:$0xff]  ;;  %v228_v25 = vmov 0.0  }
   0x2   :  { %128 = vperm.xlu0 %226, %v121_v1   ;;  %v126_v4 = vand.u32 127, %v125_v3  ;;  %v119_v5 = vld [vmem:[%s283_s0] sm:$0xff]  ;;  %v120_v8 = vld [vmem:[%s283_s0 + $0x8] sm:$0xff]  ;;  %117 = vst.msk [vmem:[#allocation2] sm:$0x1] %vm116_vm3, %v228_v25 }
   0x3   :  { %v123_v11 = vld [vmem:[%s284_s2] sm:$0xff]  ;;  %v124_v12 = vld [vmem:[%s284_s2 + $0x8] sm:$0xff]  ;;  %118 = vst.msk [vmem:[#allocation3] sm:$0x1] %vm116_vm3, %v228_v25 }
   0x4   :  { %v164_v13 = vsel %vm146_vm2, %v123_v11, 0.0  ;;  %v165_v14 = vsel %vm146_vm2, %v124_v12, 0.0 }
   0x5   :  { %v166_v15 = vadd.f32 %v165_v14, %v164_v13 }
   0x6   :  { %131 = vperm.xlu0 %226, %v122_v2  }
   0x9   :  { %v141_v40 = vld [vmem:[#allocation2] sm:$0x1] }
   0xa   :  { %v163_v41 = vld [vmem:[#allocation3] sm:$0x1] }
  0x81   :  { %v129_v6 = vpop.permute.xlu0 %128 }
  0x82   :  { %vm133_vm0 = vcmp.eq.s32.totalorder %v126_v4, %v129_v6 }
  0x83   :  { %v135_v7 = vsel %vm133_vm0, %v119_v5, 0.0 }
  0x84   :  { %137 = vadd.xlane.f32.xlu1 %v135_v7 }
  0x85   :  { %v132_v9 = vpop.permute.xlu0 %131 }
  0x86   :  { %vm134_vm1 = vcmp.eq.s32.totalorder %v126_v4, %v132_v9 }
  0x87   :  { %v136_v10 = vsel %vm134_vm1, %v120_v8, 0.0 }
  0x88   :  { %139 = vadd.xlane.f32.xlu1 %v136_v10 }
  0x8c   :  { %167 = vadd.xlane.f32.xlu1 %v166_v15 }
 0x111   :  { %v138_v16 = vpop.xlane.xlu1 %137 }
 0x112   :  { %v142_v17 = vsub.f32 0.0, %v138_v16 }
 0x114   :  { %v144_v19 = vmul.f32 %v142_v17, %v123_v11 }
 0x115   :  { %v140_v18 = vpop.xlane.xlu1 %139 }
 0x116   :  { %v143_v20 = vsub.f32 0.0, %v140_v18  ;;  %v147_v22 = vsel %vm146_vm2, %v144_v19, 0.0 }
 0x118   :  { %v145_v21 = vmul.f32 %v143_v20, %v124_v12 }
 0x119   :  { %v168_v26 = vpop.xlane.xlu1 %167 }
 0x11a   :  { %v148_v23 = vsel %vm146_vm2, %v145_v21, 0.0  ;;  %v169_v27 = vrot.slane %v168_v26, 4 }
 0x11b   :  { %v149_v24 = vadd.f32 %v148_v23, %v147_v22 }
 0x11c   :  { %v170_v28 = vadd.f32 %v169_v27, %v168_v26 }
 0x11d   :  { %150 = vadd.xlane.f32.xlu0 %v149_v24 }
 0x11e   :  { %v171_v29 = vrot.slane %v170_v28, 2 }
 0x120   :  { %v172_v33 = vadd.f32 %v171_v29, %v170_v28 }
 0x122   :  { %v173_v36 = vrot.slane %v172_v33, 1 }
 0x124   :  { %v174_v39 = vadd.f32 %v173_v36, %v172_v33 }
 0x1aa   :  { %v151_v30 = vpop.xlane.xlu0 %150 }
 0x1ab   :  { %v152_v31 = vrot.slane %v151_v30, 4 }
 0x1ad   :  { %v153_v32 = vadd.f32 %v152_v31, %v151_v30 }
 0x1af   :  { %v154_v34 = vrot.slane %v153_v32, 2 }
 0x1b1   :  { %v155_v35 = vadd.f32 %v154_v34, %v153_v32 }
 0x1b3   :  { %v156_v37 = vrot.slane %v155_v35, 1 }
 0x1b5   :  { %v157_v38 = vadd.f32 %v156_v37, %v155_v35 }
 0x1b7   :  { %216 = vpush %v157_v38 }
 0x1b8   :  { %218 = vpush %v174_v39 }
 0x1e8   :  { %s217_s0 = spop %216 }
 0x1e9   :  { %v159_v42 = vstv %s217_s0  ;;  %s219_s2 = spop %218 }
 0x1ea   :  { %v160_v43 = vadd.f32 %v159_v42, %v141_v40  ;;  %v176_v44 = vstv %s219_s2 }
 0x1eb   :  { %v177_v45 = vadd.f32 %v176_v44, %v163_v41 }
 0x1ec   :  { %162 = vst.msk [vmem:[#allocation2] sm:$0x1] %vm116_vm3, %v160_v43 }
 0x1ed   :  { %178 = vst.msk [vmem:[#allocation3] sm:$0x1] %vm116_vm3, %v177_v45 }
 0x1f3   :  { %v182_v46 = vld [vmem:[#allocation2] sm:$0x1] }
 0x1f4   :  { %220 = vpush %v182_v46  ;;  %v186_v47 = vld [vmem:[#allocation3] sm:$0x1] }
 0x1f5   :  { %222 = vpush %v186_v47 }
 0x225   :  { %s221_s26 = spop %220 }
 0x226   :  { %v184_v48 = vstv %s221_s26  ;;  %s223_s27 = spop %222 }
 0x227   :  { %185 = vst [vmem:[%s285_s3] sm:$0xff] %v184_v48  ;;  %v188_v49 = vstv %s223_s27 }
 0x228   :  { %189 = vst [vmem:[%s286_s4] sm:$0xff] %v188_v49 }

</bundles_post_ra>
